<compile_context>
chip_gen: v6e
topology: v6e:2x2x1
jax: 0.10.0
libtpu: 0.0.40
codegen_flags: <defaults>
</compile_context>

<pallas_src>
import jax
import jax.numpy as jnp
import numpy as np
from jax.experimental import pallas as pl
from jax.experimental.pallas import tpu as pltpu

OMEGA_0 = 30.0
HIDDEN_CHANNELS = 32
OUT_CHANNELS = 10
IN_CHANNELS = 1  # KernelNet consumes a 1-channel relative-position coordinate


# ----------------------------- Pallas kernel ------------------------------ #
def kernelnet_kernel(x_ref, w1_ref, b1_ref, w2_ref, w3_ref, o_ref):
    # x_ref:  (1, tl)      positions on the lane axis
    # w1_ref: (H, 1)       = omega_0 * W1n
    # b1_ref: (H, 1)       = omega_0 * b1
    # w2_ref: (H, H+1)     = omega_0 * [W2n | b2]
    # w3_ref: (O, H+1)     = [W3n | b3]
    # o_ref:  (O, tl)
    x = x_ref[...]                                            # (1, tl)
    tl = x.shape[-1]
    ones = jnp.ones((1, tl), jnp.float32)                     # hoisted constant

    # Layer 1: Cin == 1 -> broadcast FMA on the VPU (omega_0 pre-folded).
    h = jnp.sin(w1_ref[...] * x + b1_ref[...])                # (H, tl)

    # Layer 2: bias folded into the MXU matmul via the appended ones row.
    h = jnp.concatenate([h, ones], axis=0)                    # (H+1, tl)
    h = jnp.sin(jnp.dot(w2_ref[...], h,
                        preferred_element_type=jnp.float32))  # (H, tl)

    # Layer 3: bias folded the same way.
    h = jnp.concatenate([h, ones], axis=0)                    # (H+1, tl)
    o = jnp.dot(w3_ref[...], h, preferred_element_type=jnp.float32)
    o_ref[...] = o.astype(o_ref.dtype)                        # lane-dense store


def _choose_tile(n, target=2048, min_steps=4):
    """Lane tile: multiple of 128, up to `target`.  Shrunk (floor 512) when
    that exposes >= min_steps grid steps so both v7x TensorCores get work."""
    n128 = ((n + 127) // 128) * 128
    tl = max(128, (min(target, n128) // 128) * 128)
    while tl > 512 and (n128 + tl - 1) // tl < min_steps:
        tl = max(512, ((tl // 2) // 128) * 128)
    n_pad = ((n + tl - 1) // tl) * tl
    return tl, n_pad


def kernelnet_forward(x_ncl, params, *, omega_0=OMEGA_0, lane_tile=2048):
    """x_ncl: (B, 1, L) float32. Returns (B, OUT_CHANNELS, L)."""
    w1, b1, w2, b2, w3, b3 = params
    B, cin, L = x_ncl.shape
    hidden = w2.shape[0]
    cout = w3.shape[0]
    assert cin == 1 and w1.shape == (hidden, 1), "KernelNet consumes 1 channel"

    f32 = jnp.float32
    # Fold omega_0 into layers 1/2 (kernel computes plain sin) and fold the
    # layer-2/3 biases into the matmul weights as an extra K column.  These
    # are tiny (32x1 / 32x33 / 10x33) one-off scalings outside the grid.
    w1s = (omega_0 * w1).astype(f32)                                  # (H, 1)
    b1s = (omega_0 * b1)[:, None].astype(f32)                         # (H, 1)
    w2a = jnp.concatenate([omega_0 * w2, (omega_0 * b2)[:, None]],
                          axis=1).astype(f32)                         # (H, H+1)
    w3a = jnp.concatenate([w3, b3[:, None]], axis=1).astype(f32)      # (O, H+1)

    # Flatten batch into the lane axis: (B, 1, L) -> (1, B*L); pad once.
    n = B * L
    x_flat = x_ncl.astype(f32).reshape(1, n)
    tl, n_pad = _choose_tile(n, lane_tile)
    if n_pad != n:
        x_flat = jnp.pad(x_flat, ((0, 0), (0, n_pad - n)))

    cost = pl.CostEstimate(
        flops=2 * n_pad * (hidden * cin + hidden * (hidden + 1)
                           + cout * (hidden + 1)),
        transcendentals=2 * hidden * n_pad,
        bytes_accessed=4 * n_pad * (cin + cout)
        + 4 * (w1s.size + b1s.size + w2a.size + w3a.size),
    )

    out = pl.pallas_call(
        kernelnet_kernel,
        out_shape=jax.ShapeDtypeStruct((cout, n_pad), f32),
        grid_spec=pltpu.PrefetchScalarGridSpec(
            num_scalar_prefetch=0,
            grid=(n_pad // tl,),
            in_specs=[
                pl.BlockSpec((1, tl), lambda i: (0, i)),      # positions
                pl.BlockSpec(w1s.shape, lambda i: (0, 0)),    # resident weights
                pl.BlockSpec(b1s.shape, lambda i: (0, 0)),
                pl.BlockSpec(w2a.shape, lambda i: (0, 0)),
                pl.BlockSpec(w3a.shape, lambda i: (0, 0)),
            ],
            out_specs=pl.BlockSpec((cout, tl), lambda i: (0, i)),
        ),
        compiler_params=pltpu.CompilerParams(
            dimension_semantics=("parallel",)),
        cost_estimate=cost,
    )(x_flat, w1s, b1s, w2a, w3a)

    # (O, n_pad) -> (B, O, L)
    out = out[:, :n].reshape(cout, B, L)
    return jnp.transpose(out, (1, 0, 2))


# --------------------------- parameter setup ------------------------------ #
def _weight_norm(v, g):
    # v: (Cout, Cin, 1) conv weight, g: (Cout, 1, 1). PyTorch weight_norm
    # (dim=0): W = g * v / ||v||, norm over all dims except 0.
    norm = jnp.sqrt(jnp.sum(v * v, axis=(1, 2), keepdims=True))
    return g * v / norm


def init_kernelnet_params(key, out_channels=OUT_CHANNELS,
                          hidden_channels=HIDDEN_CHANNELS, omega_0=OMEGA_0):
    """Deterministic init mirroring KernelNet.initialize()."""
    k1, k2, k3, kb1, kb2, kb3 = jax.random.split(key, 6)

    # layer 1: Conv1d(1, hidden, 1); weight ~ U(-1, 1)
    v1 = jax.random.uniform(k1, (hidden_channels, 1, 1), jnp.float32, -1.0, 1.0)
    b1 = jax.random.uniform(kb1, (hidden_channels,), jnp.float32, -1.0, 1.0)

    # layers 2/3: weight ~ U(-sqrt(6/in)/w0, +sqrt(6/in)/w0), bias ~ U(-1, 1)
    lim = np.sqrt(6.0 / hidden_channels) / omega_0
    v2 = jax.random.uniform(k2, (hidden_channels, hidden_channels, 1),
                            jnp.float32, -lim, lim)
    b2 = jax.random.uniform(kb2, (hidden_channels,), jnp.float32, -1.0, 1.0)
    v3 = jax.random.uniform(k3, (out_channels, hidden_channels, 1),
                            jnp.float32, -lim, lim)
    b3 = jax.random.uniform(kb3, (out_channels,), jnp.float32, -1.0, 1.0)

    # weight_norm: g is initialized to ||v|| (PyTorch default); apply the
    # normalization anyway for exact semantics.
    g1 = jnp.sqrt(jnp.sum(v1 * v1, axis=(1, 2), keepdims=True))
    g2 = jnp.sqrt(jnp.sum(v2 * v2, axis=(1, 2), keepdims=True))
    g3 = jnp.sqrt(jnp.sum(v3 * v3, axis=(1, 2), keepdims=True))
    w1 = _weight_norm(v1, g1)[:, :, 0]   # (hidden, 1)
    w2 = _weight_norm(v2, g2)[:, :, 0]   # (hidden, hidden)
    w3 = _weight_norm(v3, g3)[:, :, 0]   # (out, hidden)

    return (w1, b1, w2, b2, w3, b3)


# ------------------------------ reference --------------------------------- #
def kernelnet_ref(x_ncl, params, omega_0=OMEGA_0):
    w1, b1, w2, b2, w3, b3 = params
    h = jnp.sin(omega_0 * (jnp.einsum('hc,bcl->bhl', w1, x_ncl)
                           + b1[None, :, None]))
    h = jnp.sin(omega_0 * (jnp.einsum('hc,bcl->bhl', w2, h)
                           + b2[None, :, None]))
    return jnp.einsum('oc,bcl->bol', w3, h) + b3[None, :, None]


# --------------------------------- main ------------------------------------ #
if __name__ == "__main__":
    key = jax.random.PRNGKey(0)
    kx, kp = jax.random.split(key)

    B, L = 2, 16
    # KernelNet is evaluated on a 1-channel relative-position coordinate.
    x = jax.random.uniform(kx, (B, IN_CHANNELS, L), jnp.float32, -1.0, 1.0)

    params = init_kernelnet_params(kp)

    out = kernelnet_forward(x, params)
    out = jax.block_until_ready(out)

    ref = kernelnet_ref(x, params)
    assert out.shape == (B, OUT_CHANNELS, L), out.shape
    # omega_0 / bias folding changes fp op order slightly vs. the reference,
    # so allow a little extra absolute slack on O(1)-magnitude outputs.
    np.testing.assert_allclose(np.asarray(out), np.asarray(ref),
                               rtol=1e-5, atol=1e-4)
    print("KERNEL_OK")
</pallas_src>

<mosaic_0001>
module attributes {stable_mosaic.version = 11 : i64} {
  func.func @kernelnet_kernel(%arg0: i32, %arg1: memref<1x128xf32, #tpu.memory_space<vmem>>, %arg2: memref<32x1xf32, #tpu.memory_space<vmem>>, %arg3: memref<32x1xf32, #tpu.memory_space<vmem>>, %arg4: memref<32x33xf32, #tpu.memory_space<vmem>>, %arg5: memref<10x33xf32, #tpu.memory_space<vmem>>, %arg6: memref<10x128xf32, #tpu.memory_space<vmem>>) attributes {dimension_semantics = [#tpu.dimension_semantics<parallel>], iteration_bounds = array<i64: 1>, scalar_prefetch = 0 : i64, scratch_operands = 0 : i64, tpu.core_type = #tpu.core_type<tc>, window_params = [{transform_indices = @transform_0, window_bounds = array<i64: 1, 128>}, {pipeline_mode = #tpu.pipeline_mode<synchronous>, transform_indices = @transform_1, window_bounds = array<i64: 32, 1>}, {pipeline_mode = #tpu.pipeline_mode<synchronous>, transform_indices = @transform_2, window_bounds = array<i64: 32, 1>}, {pipeline_mode = #tpu.pipeline_mode<synchronous>, transform_indices = @transform_3, window_bounds = array<i64: 32, 33>}, {pipeline_mode = #tpu.pipeline_mode<synchronous>, transform_indices = @transform_4, window_bounds = array<i64: 10, 33>}, {transform_indices = @transform_5, window_bounds = array<i64: 10, 128>}]} {
    %c0 = arith.constant 0 : index
    %c0_0 = arith.constant 0 : index
    %0 = vector.load %arg1[%c0, %c0_0] : memref<1x128xf32, #tpu.memory_space<vmem>>, vector<1x128xf32>
    %cst = arith.constant 1.000000e+00 : f32
    %1 = vector.broadcast %cst : f32 to vector<1x128xf32>
    %c0_1 = arith.constant 0 : index
    %c0_2 = arith.constant 0 : index
    %2 = vector.load %arg2[%c0_1, %c0_2] : memref<32x1xf32, #tpu.memory_space<vmem>>, vector<32x1xf32>
    %3 = vector.broadcast %2 : vector<32x1xf32> to vector<32x128xf32>
    %4 = vector.broadcast %0 : vector<1x128xf32> to vector<32x128xf32>
    %5 = arith.mulf %3, %4 : vector<32x128xf32>
    %c0_3 = arith.constant 0 : index
    %c0_4 = arith.constant 0 : index
    %6 = vector.load %arg3[%c0_3, %c0_4] : memref<32x1xf32, #tpu.memory_space<vmem>>, vector<32x1xf32>
    %7 = vector.broadcast %6 : vector<32x1xf32> to vector<32x128xf32>
    %8 = arith.addf %5, %7 : vector<32x128xf32>
    %9 = math.sin %8 : vector<32x128xf32>
    %10 = tpu.concatenate %9, %1 in 0 : vector<32x128xf32>, vector<1x128xf32> -> vector<33x128xf32>
    %c0_5 = arith.constant 0 : index
    %c0_6 = arith.constant 0 : index
    %11 = vector.load %arg4[%c0_5, %c0_6] : memref<32x33xf32, #tpu.memory_space<vmem>>, vector<32x33xf32>
    %cst_7 = arith.constant dense<0.000000e+00> : vector<32x128xf32>
    %12 = tpu.matmul %11, %10, %cst_7 {dimension_numbers = #tpu.dot_dimension_numbers<[1], [0], [0], [1], [0, 0, 1, 1], [], []>} : vector<32x33xf32>, vector<33x128xf32>, vector<32x128xf32> -> vector<32x128xf32>
    %13 = math.sin %12 : vector<32x128xf32>
    %14 = tpu.concatenate %13, %1 in 0 : vector<32x128xf32>, vector<1x128xf32> -> vector<33x128xf32>
    %c0_8 = arith.constant 0 : index
    %c0_9 = arith.constant 0 : index
    %15 = vector.load %arg5[%c0_8, %c0_9] : memref<10x33xf32, #tpu.memory_space<vmem>>, vector<10x33xf32>
    %cst_10 = arith.constant dense<0.000000e+00> : vector<10x128xf32>
    %16 = tpu.matmul %15, %14, %cst_10 {dimension_numbers = #tpu.dot_dimension_numbers<[1], [0], [0], [1], [0, 0, 1, 1], [], []>} : vector<10x33xf32>, vector<33x128xf32>, vector<10x128xf32> -> vector<10x128xf32>
    %c0_11 = arith.constant 0 : index
    %c0_12 = arith.constant 0 : index
    %17 = vector.load %arg6[%c0_11, %c0_12] : memref<10x128xf32, #tpu.memory_space<vmem>>, vector<10x128xf32>
    tpu.vector_store %arg6[%c0_11, %c0_12], %16 {strides = array<i32>} : memref<10x128xf32, #tpu.memory_space<vmem>>, vector<10x128xf32>,
    return
  }
  func.func @transform_0(%arg0: i32) -> (i32, i32) {
    %c0_i32 = arith.constant 0 : i32
    %c0_i32_0 = arith.constant 0 : i32
    return %c0_i32, %arg0 : i32, i32
  }
  func.func @transform_1(%arg0: i32) -> (i32, i32) {
    %c0_i32 = arith.constant 0 : i32
    %c0_i32_0 = arith.constant 0 : i32
    %c0_i32_1 = arith.constant 0 : i32
    return %c0_i32, %c0_i32_0 : i32, i32
  }
  func.func @transform_2(%arg0: i32) -> (i32, i32) {
    %c0_i32 = arith.constant 0 : i32
    %c0_i32_0 = arith.constant 0 : i32
    %c0_i32_1 = arith.constant 0 : i32
    return %c0_i32, %c0_i32_0 : i32, i32
  }
  func.func @transform_3(%arg0: i32) -> (i32, i32) {
    %c0_i32 = arith.constant 0 : i32
    %c0_i32_0 = arith.constant 0 : i32
    %c0_i32_1 = arith.constant 0 : i32
    return %c0_i32, %c0_i32_0 : i32, i32
  }
  func.func @transform_4(%arg0: i32) -> (i32, i32) {
    %c0_i32 = arith.constant 0 : i32
    %c0_i32_0 = arith.constant 0 : i32
    %c0_i32_1 = arith.constant 0 : i32
    return %c0_i32, %c0_i32_0 : i32, i32
  }
  func.func @transform_5(%arg0: i32) -> (i32, i32) {
    %c0_i32 = arith.constant 0 : i32
    %c0_i32_0 = arith.constant 0 : i32
    return %c0_i32, %arg0 : i32, i32
  }
}

</mosaic_0001>

<bundles_post_ra>
// kernel: tpu_custom_call.1
= control target key start
LH: loop header
LB: loop body
LE: loop exit
PB: predicated region body
PF: predicated region fallthrough
CT: control target
= control target key end

     0   :  { %v1308_v2 = vmov 0   ;;  %s1941_s0 = inlined_call_operand.vmem [shape: f32[1,128], index: 0, kind: input, shape index: {}]   ;;  %s1942_s1 = inlined_call_operand.vmem [shape: f32[32,1], index: 1, kind: input, shape index: {}]   ;;  %s1943_s2 = inlined_call_operand.vmem [shape: f32[32,1], index: 2, kind: input, shape index: {}]   ;;  %s1944_s3 = inlined_call_operand.vmem [shape: f32[32,33], index: 3, kind: input, shape index: {}]   ;;  %s1945_s4 = inlined_call_operand.vmem [shape: f32[10,33], index: 4, kind: input, shape index: {}]   ;;  %s1946_s5 = inlined_call_operand.hbm [shape: f32[10,128], index: 5, kind: output, shape index: {}]  }
   0x1   :  { %v59_v0 = vld [vmem:[%s1943_s2 + $0x18] sm:$0xff]  ;;  %1253 = vset.pattern.permute.xlu1 %v1308_v2  ;;  %1252 = vset.pattern.permute.xlu0 %v1308_v2  ;;  %v24_v3 = vld [vmem:[%s1942_s1 + $0x10] sm:$0xff]  ;;  %v23_v4 = vld [vmem:[%s1942_s1 + $0x8] sm:$0xff] }
   0x2   :  { %v25_v1 = vld [vmem:[%s1942_s1 + $0x18] sm:$0xff]  ;;  %77 = vperm.xlu1 %1253, %v59_v0  }
   0x3   :  { %43 = vperm.xlu0 %1252, %v25_v1  }
   0x4   :  { %10 = vsyncpa [#allocation3], 0  ;;  %v58_v5 = vld [vmem:[%s1943_s2 + $0x10] sm:$0xff]  ;;  %v22_v6 = vld [vmem:[%s1942_s1] sm:$0xff]  ;;  %vm517_vm0 = vcmask 1040384   ;;  %v1309_v9 = vmov 1.0  }
   0x5   :  { %v57_v7 = vld [vmem:[%s1943_s2 + $0x8] sm:$0xff]  ;;  %v56_v8 = vld [vmem:[%s1943_s2] sm:$0xff]  ;;  %1180 = vmatprep.subr.msk.mxu0 %vm517_vm0, %v1309_v9  ;;  %1196 = vmatprep.subr.msk.mxu1 %vm517_vm0, %v1309_v9  ;;  %v1310_v57 = vmov 683565275   ;;  %v1311_v59 = vmov 2475754826  }
   0x6   :  { %33 = vperm.xlu1 %1253, %v23_v4   ;;  %1181 = vmatpush3.msk.msra.mxu0 %vm517_vm0, %v1309_v9  ;;  %v1123_v10 = vld [vmem:[%s1941_s0] ss:$0 sm:$0xff]  ;;  %v1312_v62 = vmov 2131351028   ;;  %v1313_v0 = vmov 2102212464  }
   0x7   :  { %38 = vperm.xlu0 %1252, %v24_v3   ;;  %1197 = vmatpush3.msk.msra.mxu1 %vm517_vm0, %v1309_v9  ;;  %v1314_v2 = vmov 920167782   ;;  %v1315_v9 = vmov 1326507024   ;;  %s1316_s19 = smov [#allocation2]  }
   0x8   :  { %s1112_s20 = sshll.u32 %s1316_s19, 4  ;;  %s1113_s20 = int_to_ptr.vmem [resolvable:$true] %s1112_s20 }
   0x9   :  { %s1286_s21 = scalar_lea.vmem %s1113_s20, 256  ;;  %p1291_p1 = scmp.lt.s32.totalorder %s1113_s20, %s1113_s20 }
   0xa   :  { %28 = vperm.xlu1 %1253, %v22_v6   ;;  %p1287_p0 = scmp.ne.s32.totalorder %s1113_s20, %s1286_s21  ;;  %p1292_p2 = scmp.lt.s32.totalorder %s1286_s21, %s1286_s21 }
   0xb   :  { %72 = vperm.xlu0 %1252, %v58_v5  }
   0xc   :  { %p1293_p3 = por %p1292_p2, %p1291_p1 }
   0xe   :  { %62 = vperm.xlu1 %1253, %v56_v8   ;;  %p1294_p4 = pnand %p1293_p3, %p1287_p0 }
   0xf   :  { %67 = vperm.xlu0 %1252, %v57_v7  }
  0x7d   :  { %v78_v11 = vpop.permute.xlu1 %77 }
  0x7e   :  { %v44_v12 = vpop.permute.xlu0 %43 }
  0x7f   :  { %v55_v13 = vmul.f32 %v1123_v10, %v44_v12 }
  0x81   :  { %v1376_v14 = vadd.f32 %v78_v11, %v55_v13  ;;  %v34_v16 = vpop.permute.xlu1 %33 }
  0x82   :  { %v39_v15 = vpop.permute.xlu0 %38  ;;  %v53_v25 = vmul.f32 %v1123_v10, %v34_v16 }
  0x83   :  { %v399_v17 = vand.u32 2139095040, %v1376_v14  ;;  %v54_v19 = vmul.f32 %v1123_v10, %v39_v15  ;;  %v396_v51 = vand.u32 2147483647, %v1376_v14 }
  0x85   :  { %v400_v18 = vshrl.u32 %v399_v17, 23  ;;  %v29_v21 = vpop.permute.xlu1 %28 }
  0x86   :  { %v73_v20 = vpop.permute.xlu0 %72  ;;  %v52_v31 = vmul.f32 %v1123_v10, %v29_v21 }
  0x87   :  { %v1136_v22 = vadd.s32 4294967169, %v400_v18  ;;  %v1379_v23 = vadd.f32 %v73_v20, %v54_v19 }
  0x89   :  { %v406_v24 = vadd.s32 1, %v1136_v22  ;;  %v292_v26 = vand.u32 2147483647, %v1379_v23  ;;  %v295_v27 = vand.u32 2139095040, %v1379_v23  ;;  %v63_v29 = vpop.permute.xlu1 %62 }
  0x8a   :  { %v68_v28 = vpop.permute.xlu0 %67  ;;  %v1387_v35 = vadd.f32 %v63_v29, %v52_v31 }
  0x8b   :  { %v296_v30 = vshrl.u32 %v295_v27, 23  ;;  %v1383_v32 = vadd.f32 %v68_v28, %v53_v25  ;;  %vm407_vm1 = vcmp.gt.s32.totalorder %v406_v24, 0  ;;  %v299_v34 = vand.u32 8388607, %v292_v26 }
  0x8c   :  { %v1391_v38 = vsel %vm407_vm1, %v406_v24, 0  ;;  %v84_v43 = vand.u32 2147483647, %v1387_v35  ;;  %v87_v44 = vand.u32 2139095040, %v1387_v35 }
  0x8d   :  { %v1132_v33 = vadd.s32 4294967169, %v296_v30  ;;  %v188_v36 = vand.u32 2147483647, %v1383_v32  ;;  %v191_v37 = vand.u32 2139095040, %v1383_v32  ;;  %v300_v41 = vor.u32 8388608, %v299_v34 }
  0x8e   :  { %v88_v47 = vshrl.u32 %v87_v44, 23  ;;  %v1398_v48 = vand.u32 31, %v1391_v38  ;;  %v1405_v55 = vand.u32 8388607, %v84_v43 }
  0x8f   :  { %v302_v39 = vadd.s32 1, %v1132_v33  ;;  %v192_v40 = vshrl.u32 %v191_v37, 23  ;;  %v195_v42 = vand.u32 8388607, %v188_v36  ;;  %v1401_v52 = vshll.u32 %v300_v41, 8 }
  0x90   :  { %v1124_v61 = vadd.s32 4294967169, %v88_v47 }
  0x91   :  { %vm303_vm2 = vcmp.gt.s32.totalorder %v302_v39, 0  ;;  %v1128_v45 = vadd.s32 4294967169, %v192_v40  ;;  %v196_v53 = vor.u32 8388608, %v195_v42 }
  0x92   :  { %v304_v46 = vsel %vm303_vm2, %v302_v39, 0  ;;  %v94_v39 = vadd.s32 1, %v1124_v61 }
  0x93   :  { %v305_v49 = vshrl.u32 %v304_v46, 5  ;;  %v306_v50 = vand.u32 31, %v304_v46  ;;  %v198_v54 = vadd.s32 1, %v1128_v45  ;;  %v1427_v37 = vshll.u32 %v196_v53, 8 }
  0x94   :  { %vm95_vm12 = vcmp.gt.s32.totalorder %v94_v39, 0 }
  0x95   :  { %v307_v56 = vsub.s32 32, %v306_v50  ;;  %v309_v58 = vshll.u32 %v1310_v57, %v306_v50  ;;  %v312_v60 = vshll.u32 %v1311_v59, %v306_v50  ;;  %v315_v63 = vshll.u32 %v1312_v62, %v306_v50 }
  0x96   :  { %v318_v1 = vshll.u32 %v1313_v0, %v306_v50  ;;  %v321_v3 = vshll.u32 %v1314_v2, %v306_v50  ;;  %vm324_vm3 = vcmp.lt.s32.totalorder %v305_v49, 1  ;;  %vm325_vm4 = vcmp.lt.s32.totalorder %v305_v49, 2 }
  0x97   :  { %v310_v4 = vshrl.u32 %v1311_v59, %v307_v56  ;;  %v313_v5 = vshrl.u32 %v1312_v62, %v307_v56  ;;  %v316_v6 = vshrl.u32 %v1313_v0, %v307_v56  ;;  %v308_v7 = vshrl.u32 %v1310_v57, %v307_v56 }
  0x98   :  { %v319_v8 = vshrl.u32 %v1314_v2, %v307_v56  ;;  %v322_v10 = vshrl.u32 %v1315_v9, %v307_v56  ;;  %vm326_vm5 = vcmp.lt.s32.totalorder %v305_v49, 3  ;;  %vm199_vm6 = vcmp.gt.s32.totalorder %v198_v54, 0 }
  0x99   :  { %v311_v11 = vor.u32 %v310_v4, %v309_v58  ;;  %v314_v12 = vor.u32 %v313_v5, %v312_v60  ;;  %v317_v13 = vor.u32 %v316_v6, %v315_v63  ;;  %vm327_vm7 = vcmp.lt.s32.totalorder %v305_v49, 4 }
  0x9a   :  { %v320_v15 = vor.u32 %v319_v8, %v318_v1  ;;  %v323_v16 = vor.u32 %v322_v10, %v321_v3  ;;  %v200_v17 = vsel %vm199_vm6, %v198_v54, 0 }
  0x9b   :  { %v328_v18 = vsel %vm324_vm3, %v308_v7, %v311_v11  ;;  %v329_v19 = vsel %vm327_vm7, %v317_v13, 2102212464  ;;  %v332_v20 = vsel %vm324_vm3, %v311_v11, %v314_v12  ;;  %v336_v21 = vsel %vm324_vm3, %v314_v12, %v317_v13 }
  0x9c   :  { %v330_v22 = vsel %vm326_vm5, %v314_v12, %v329_v19  ;;  %v333_v24 = vsel %vm327_vm7, %v320_v15, 920167782  ;;  %v337_v25 = vsel %vm327_vm7, %v323_v16, 1326507024  ;;  %v201_v27 = vshrl.u32 %v200_v17, 5 }
  0x9d   :  { %v331_v28 = vsel %vm325_vm4, %v328_v18, %v330_v22  ;;  %v334_v29 = vsel %vm326_vm5, %v317_v13, %v333_v24  ;;  %v338_v30 = vsel %vm326_vm5, %v320_v15, %v337_v25  ;;  %v202_v31 = vand.u32 31, %v200_v17 }
  0x9e   :  { %v335_v33 = vsel %vm325_vm4, %v332_v20, %v334_v29  ;;  %v339_v34 = vsel %vm325_vm4, %v336_v21, %v338_v30  ;;  %v347_v45 = vmul.u32 %v1401_v52, %v331_v28  ;;  %vm220_vm8 = vcmp.lt.s32.totalorder %v201_v27, 1 }
  0x9f   :  { %v1430_v40 = vmul.u32.u64.low %v1401_v52, %v339_v34  ;;  %v1431_v41 = vmul.u32.u64.high %v1401_v52, %v339_v34, %v1430_v40  ;;  %v1434_v42 = vmul.u32.u64.low %v1401_v52, %v335_v33  ;;  %v1435_v44 = vmul.u32.u64.high %v1401_v52, %v335_v33, %v1434_v42 }
  0xa0   :  { %v203_v46 = vsub.s32 32, %v202_v31  ;;  %v205_v47 = vshll.u32 %v1310_v57, %v202_v31  ;;  %v208_v49 = vshll.u32 %v1311_v59, %v202_v31  ;;  %v211_v50 = vshll.u32 %v1312_v62, %v202_v31 }
  0xa1   :  { %v214_v53 = vshll.u32 %v1313_v0, %v202_v31  ;;  %v217_v54 = vshll.u32 %v1314_v2, %v202_v31  ;;  %vm222_vm9 = vcmp.lt.s32.totalorder %v201_v27, 3  ;;  %vm349_vm10 = vc.u32 %v1431_v41, %v1434_v42 }
  0xa2   :  { %v206_v56 = vshrl.u32 %v1311_v59, %v203_v46  ;;  %v209_v58 = vshrl.u32 %v1312_v62, %v203_v46  ;;  %v212_v60 = vshrl.u32 %v1313_v0, %v203_v46  ;;  %v350_v52 = vadd.s32 1, %v1435_v44 }
  0xa3   :  { %v204_v61 = vshrl.u32 %v1310_v57, %v203_v46  ;;  %v215_v63 = vshrl.u32 %v1314_v2, %v203_v46  ;;  %v218_v5 = vshrl.u32 %v1315_v9, %v203_v46  ;;  %vm223_vm11 = vcmp.lt.s32.totalorder %v201_v27, 4 }
  0xa4   :  { %v207_v1 = vor.u32 %v206_v56, %v205_v47  ;;  %v210_v3 = vor.u32 %v209_v58, %v208_v49  ;;  %v213_v4 = vor.u32 %v212_v60, %v211_v50  ;;  %v351_v6 = vsel %vm349_vm10, %v350_v52, %v1435_v44 }
  0xa5   :  { %v216_v7 = vor.u32 %v215_v63, %v214_v53  ;;  %v352_v8 = vadd.s32 %v351_v6, %v347_v45  ;;  %v219_v10 = vor.u32 %v218_v5, %v217_v54  ;;  %vm221_vm13 = vcmp.lt.s32.totalorder %v201_v27, 2 }
  0xa6   :  { %v224_v11 = vsel %vm220_vm8, %v204_v61, %v207_v1  ;;  %v225_v12 = vsel %vm223_vm11, %v213_v4, 2102212464  ;;  %v228_v15 = vsel %vm220_vm8, %v207_v1, %v210_v3  ;;  %v232_v17 = vsel %vm220_vm8, %v210_v3, %v213_v4 }
  0xa7   :  { %v226_v13 = vsel %vm222_vm9, %v210_v3, %v225_v12  ;;  %v229_v16 = vsel %vm223_vm11, %v216_v7, 920167782  ;;  %v353_v18 = vadd.s32 536870912, %v352_v8  ;;  %v233_v20 = vsel %vm223_vm11, %v219_v10, 1326507024 }
  0xa8   :  { %v230_v19 = vsel %vm222_vm9, %v213_v4, %v229_v16  ;;  %v227_v21 = vsel %vm221_vm13, %v224_v11, %v226_v13  ;;  %v234_v24 = vsel %vm222_vm9, %v216_v7, %v233_v20  ;;  %v96_v25 = vsel %vm95_vm12, %v94_v39, 0 }
  0xa9   :  { %v231_v22 = vsel %vm221_vm13, %v228_v15, %v230_v19  ;;  %v1461_v28 = vshrl.u32 %v353_v18, 30  ;;  %v235_v29 = vsel %vm221_vm13, %v232_v17, %v234_v24  ;;  %v98_v40 = vand.u32 31, %v96_v25 }
  0xaa   :  { %v1464_v30 = vmul.u32.u64.low %v1427_v37, %v231_v22  ;;  %v1465_v31 = vmul.u32.u64.high %v1427_v37, %v231_v22, %v1464_v30  ;;  %v1469_v33 = vmul.u32.u64.low %v1427_v37, %v235_v29  ;;  %v1470_v34 = vmul.u32.u64.high %v1427_v37, %v235_v29, %v1469_v33 }
  0xab   :  { %v1473_v44 = vsub.s32 32, %v1398_v48  ;;  %v355_v27 = vshll.u32 %v1461_v28, 30  ;;  %v92_v39 = vor.u32 8388608, %v1405_v55  ;;  %v1479_v45 = vand.u32 8388607, %v396_v51 }
  0xac   :  { %v243_v46 = vmul.u32 %v1427_v37, %v227_v21  ;;  %v97_v47 = vshrl.u32 %v96_v25, 5  ;;  %v99_v49 = vsub.s32 32, %v98_v40  ;;  %v101_v50 = vshll.u32 %v1310_v57, %v98_v40 }
  0xad   :  { %v1483_v53 = vsub.s32 %v352_v8, %v355_v27  ;;  %v246_v54 = vadd.s32 1, %v1465_v31  ;;  %v104_v56 = vshll.u32 %v1311_v59, %v98_v40  ;;  %v107_v58 = vshll.u32 %v1312_v62, %v98_v40 }
  0xae   :  { %vm245_vm14 = vc.u32 %v1470_v34, %v1464_v30  ;;  %v102_v55 = vshrl.u32 %v1311_v59, %v99_v49  ;;  %v110_v60 = vshll.u32 %v1313_v0, %v98_v40  ;;  %v113_v37 = vshll.u32 %v1314_v2, %v98_v40 }
  0xaf   :  { %v358_v52 = vsub.s32 0, %v1483_v53  ;;  %v247_v61 = vsel %vm245_vm14, %v246_v54, %v1465_v31  ;;  %v105_v63 = vshrl.u32 %v1312_v62, %v99_v49  ;;  %v108_v1 = vshrl.u32 %v1313_v0, %v99_v49 }
  0xb0   :  { %v248_v3 = vadd.s32 %v247_v61, %v243_v46  ;;  %v103_v4 = vor.u32 %v102_v55, %v101_v50  ;;  %v111_v5 = vshrl.u32 %v1314_v2, %v99_v49  ;;  %v114_v6 = vshrl.u32 %v1315_v9, %v99_v49 }
  0xb1   :  { %v1500_v7 = vshrl.u32 %v1391_v38, 5  ;;  %v422_v8 = vshll.u32 %v1313_v0, %v1398_v48  ;;  %v106_v10 = vor.u32 %v105_v63, %v104_v56  ;;  %v109_v11 = vor.u32 %v108_v1, %v107_v58 }
  0xb2   :  { %v423_v12 = vshrl.u32 %v1314_v2, %v1473_v44  ;;  %v249_v13 = vadd.s32 536870912, %v248_v3  ;;  %v112_v15 = vor.u32 %v111_v5, %v110_v60  ;;  %v115_v16 = vor.u32 %v114_v6, %v113_v37 }
  0xb3   :  { %v1133_v17 = vmin.u32 %v358_v52, %v1483_v53  ;;  %vm116_vm15 = vcmp.lt.s32.totalorder %v97_v47, 1  ;;  %vm119_vm0 = vcmp.lt.s32.totalorder %v97_v47, 4  ;;  %v132_v18 = vshll.u32 %v92_v39, 8 }
  0xb4   :  { %v1507_v19 = vshrl.u32 %v249_v13, 30  ;;  %vm118_vm1 = vcmp.lt.s32.totalorder %v97_v47, 3  ;;  %v124_v38 = vsel %vm116_vm15, %v103_v4, %v106_v10  ;;  %v125_v20 = vsel %vm119_vm0, %v112_v15, 920167782 }
  0xb5   :  { %vm117_vm2 = vcmp.lt.s32.totalorder %v97_v47, 2  ;;  %v121_v21 = vsel %vm119_vm0, %v109_v11, 2102212464  ;;  %v126_v22 = vsel %vm118_vm1, %v109_v11, %v125_v20  ;;  %v128_v24 = vsel %vm116_vm15, %v106_v10, %v109_v11 }
  0xb6   :  { %v251_v25 = vshll.u32 %v1507_v19, 30  ;;  %v100_v29 = vshrl.u32 %v1310_v57, %v99_v49  ;;  %v127_v31 = vsel %vm117_vm2, %v124_v38, %v126_v22  ;;  %v129_v33 = vsel %vm119_vm0, %v115_v16, 1326507024 }
  0xb7   :  { %v426_v40 = vshrl.u32 %v1315_v9, %v1473_v44  ;;  %v130_v27 = vsel %vm118_vm1, %v112_v15, %v129_v33  ;;  %v1518_v39 = vmul.u32.u64.low %v132_v18, %v127_v31  ;;  %v1519_v46 = vmul.u32.u64.high %v132_v18, %v127_v31, %v1518_v39 }
  0xb8   :  { %v1522_v50 = vsub.s32 %v248_v3, %v251_v25  ;;  %v120_v54 = vsel %vm116_vm15, %v100_v29, %v103_v4  ;;  %v122_v56 = vsel %vm118_vm1, %v106_v10, %v121_v21  ;;  %v131_v49 = vsel %vm117_vm2, %v128_v24, %v130_v27 }
  0xb9   :  { %v424_v58 = vor.u32 %v423_v12, %v422_v8  ;;  %v425_v55 = vshll.u32 %v1314_v2, %v1398_v48  ;;  %v360_v60 = vclz %v1133_v17  ;;  %v414_v37 = vshrl.u32 %v1311_v59, %v1473_v44 }
  0xba   :  { %vm431_vm3 = vcmp.lt.s32.totalorder %v1500_v7, 4  ;;  %v254_v52 = vsub.s32 0, %v1522_v50  ;;  %v1533_v61 = vmul.u32.u64.low %v132_v18, %v131_v49  ;;  %v1534_v63 = vmul.u32.u64.high %v132_v18, %v131_v49, %v1533_v61 }
  0xbb   :  { %v427_v1 = vor.u32 %v426_v40, %v425_v55  ;;  %v123_v3 = vsel %vm117_vm2, %v120_v54, %v122_v56  ;;  %v142_v4 = vadd.s32 1, %v1519_v46  ;;  %v413_v5 = vshll.u32 %v1310_v57, %v1398_v48 }
  0xbc   :  { %v1129_v6 = vmin.u32 %v254_v52, %v1522_v50  ;;  %v416_v8 = vshll.u32 %v1311_v59, %v1398_v48  ;;  %v417_v10 = vshrl.u32 %v1312_v62, %v1473_v44  ;;  %v420_v11 = vshrl.u32 %v1313_v0, %v1473_v44 }
  0xbd   :  { %v437_v47 = vsel %vm431_vm3, %v424_v58, 920167782  ;;  %v1134_v12 = vadd.s32 4294967294, %v360_v60  ;;  %v415_v13 = vor.u32 %v414_v37, %v413_v5  ;;  %v419_v15 = vshll.u32 %v1312_v62, %v1398_v48 }
  0xbe   :  { %v256_v16 = vclz %v1129_v6  ;;  %v139_v17 = vmul.u32 %v132_v18, %v123_v3  ;;  %vm141_vm4 = vc.u32 %v1534_v63, %v1518_v39  ;;  %v418_v38 = vor.u32 %v417_v10, %v416_v8 }
  0xbf   :  { %v441_v20 = vsel %vm431_vm3, %v427_v1, 1326507024  ;;  %v143_v21 = vsel %vm141_vm4, %v142_v4, %v1519_v46  ;;  %v404_v22 = vor.u32 8388608, %v1479_v45  ;;  %v421_v24 = vor.u32 %v420_v11, %v419_v15 }
  0xc0   :  { %v1130_v25 = vadd.s32 4294967294, %v256_v16  ;;  %v144_v29 = vadd.s32 %v143_v21, %v139_v17  ;;  %vm428_vm5 = vcmp.lt.s32.totalorder %v1500_v7, 1  ;;  %vm430_vm6 = vcmp.lt.s32.totalorder %v1500_v7, 3  ;;  %v500_v21 = vld [vmem:[%s1944_s3] sm:$0xff] }
  0xc1   :  { %vm1135_vm7 = vcmp.lt.s32.totalorder %v1134_v12, 0  ;;  %vm429_vm8 = vcmp.lt.s32.totalorder %v1500_v7, 2  ;;  %v436_v48 = vsel %vm428_vm5, %v415_v13, %v418_v38  ;;  %v438_v18 = vsel %vm430_vm6, %v421_v24, %v437_v47 }
  0xc2   :  { %v145_v31 = vadd.s32 536870912, %v144_v29  ;;  %v412_v33 = vshrl.u32 %v1310_v57, %v1473_v44  ;;  %v433_v45 = vsel %vm431_vm3, %v421_v24, 2102212464  ;;  %v439_v40 = vsel %vm429_vm8, %v436_v48, %v438_v18 }
  0xc3   :  { %vm1131_vm9 = vcmp.lt.s32.totalorder %v1130_v25, 0  ;;  %v440_v27 = vsel %vm428_vm5, %v418_v38, %v421_v24  ;;  %v444_v46 = vshll.u32 %v404_v22, 8  ;;  %v363_v54 = vsel %vm1135_vm7, 0, %v1134_v12 }
  0xc4   :  { %v1568_v56 = vshrl.u32 %v145_v31, 30  ;;  %v432_v49 = vsel %vm428_vm5, %v412_v33, %v415_v13  ;;  %v434_v55 = vsel %vm430_vm6, %v418_v38, %v433_v45  ;;  %v442_v60 = vsel %vm430_vm6, %v424_v58, %v441_v20 }
  0xc5   :  { %v1574_v44 = vmul.u32.u64.low %v444_v46, %v439_v40  ;;  %v1575_v37 = vmul.u32.u64.high %v444_v46, %v439_v40, %v1574_v44  ;;  %v259_v52 = vsel %vm1131_vm9, 0, %v1130_v25  ;;  %v443_v1 = vsel %vm429_vm8, %v440_v27, %v442_v60 }
  0xc6   :  { %v147_v61 = vshll.u32 %v1568_v56, 30  ;;  %v368_v3 = vsub.s32 4294967266, %v363_v54  ;;  %v1581_v4 = vmul.u32.u64.low %v444_v46, %v443_v1  ;;  %v1582_v5 = vmul.u32.u64.high %v444_v46, %v443_v1, %v1581_v4 }
  0xc7   :  { %v435_v8 = vsel %vm429_vm8, %v432_v49, %v434_v55  ;;  %v264_v10 = vsub.s32 4294967266, %v259_v52  ;;  %v454_v58 = vadd.s32 1, %v1575_v37  ;;  %v364_v13 = vsub.s32 32, %v363_v54 }
  0xc8   :  { %v148_v6 = vsub.s32 %v144_v29, %v147_v61  ;;  %v369_v47 = vadd.s32 127, %v368_v3  ;;  %v451_v12 = vmul.u32 %v444_v46, %v435_v8  ;;  %vm453_vm10 = vc.u32 %v1582_v5, %v1574_v44 }
  0xc9   :  { %v455_v16 = vsel %vm453_vm10, %v454_v58, %v1575_v37  ;;  %v265_v17 = vadd.s32 127, %v264_v10  ;;  %v348_v20 = vadd.s32 %v1434_v42, %v1431_v41  ;;  %v260_v24 = vsub.s32 32, %v259_v52 }
  0xca   :  { %v150_v11 = vsub.s32 0, %v148_v6  ;;  %v456_v38 = vadd.s32 %v455_v16, %v451_v12  ;;  %v370_v22 = vshll.u32 %v369_v47, 23  ;;  %vm504_vm11 = vcmask 269312  }
  0xcb   :  { %v366_v29 = vshrl.u32 %v348_v20, %v364_v13  ;;  %v244_v18 = vadd.s32 %v1464_v30, %v1470_v34  ;;  %v266_v31 = vshll.u32 %v265_v17, 23  ;;  %1190 = vmatprep.mubr.msk.f32.mxu0 %vm504_vm11, %v500_v21  ;;  %v365_v41 = vshll.u32 %v1483_v53, %v363_v54 }
  0xcc   :  { %v1125_v15 = vmin.u32 %v150_v11, %v148_v6  ;;  %v457_v25 = vadd.s32 536870912, %v456_v38  ;;  %v371_v42 = vor.u32 4788187, %v370_v22  ;;  %v261_v60 = vshll.u32 %v1522_v50, %v259_v52 }
  0xcd   :  { %v262_v45 = vshrl.u32 %v244_v18, %v260_v24  ;;  %v367_v46 = vor.u32 %v366_v29, %v365_v41  ;;  %v267_v37 = vor.u32 4788187, %v266_v31  ;;  %v140_v30 = vadd.s32 %v1518_v39, %v1534_v63 }
  0xce   :  { %v152_v7 = vclz %v1125_v15  ;;  %v1597_v33 = vshrl.u32 %v457_v25, 30  ;;  %v372_v1 = vand.u32 2147483647, %v371_v42  ;;  %vm294_vm14 = vcmp.lt.s32.totalorder %v1379_v23, 0 }
  0xcf   :  { %v263_v3 = vor.u32 %v262_v45, %v261_v60  ;;  %v374_v8 = vcvt.s32.f32 %v367_v46  ;;  %v268_v10 = vand.u32 2147483647, %v267_v37  ;;  %vm190_vm15 = vcmp.lt.s32.totalorder %v1383_v32, 0 }
  0xd0   :  { %v1126_v48 = vadd.s32 4294967294, %v152_v7  ;;  %v459_v27 = vshll.u32 %v1597_v33, 30  ;;  %vm1613_vm0 = vcmp.le.f32.partialorder %v292_v26, 0.7853982  ;;  %vm1624_vm1 = vcmp.le.f32.partialorder %v188_v36, 0.7853982 }
  0xd1   :  { %v375_v12 = vmul.f32 %v374_v8, %v372_v1  ;;  %v270_v13 = vcvt.s32.f32 %v263_v3  ;;  %vm86_vm2 = vcmp.lt.s32.totalorder %v1387_v35, 0  ;;  %v378_v60 = vsub.s32 4, %v1461_v28 }
  0xd2   :  { %vm1127_vm12 = vcmp.lt.s32.totalorder %v1126_v48, 0  ;;  %v460_v34 = vsub.s32 %v456_v38, %v459_v27  ;;  %v452_v38 = vadd.s32 %v1574_v44, %v1582_v5  ;;  %vm1637_vm3 = vcmp.le.f32.partialorder %v84_v43, 0.7853982 }
  0xd3   :  { %v155_v40 = vsel %vm1127_vm12, 0, %v1126_v48  ;;  %v271_v52 = vmul.f32 %v270_v13, %v268_v10  ;;  %v376_v39 = vxor.u32 2147483648, %v375_v12  ;;  %v274_v37 = vsub.s32 4, %v1507_v19 }
  0xd4   :  { %v156_v49 = vsub.s32 32, %v155_v40  ;;  %v160_v55 = vsub.s32 4294967266, %v155_v40  ;;  %v462_v54 = vsub.s32 0, %v460_v34  ;;  %v157_v58 = vshll.u32 %v148_v6, %v155_v40 }
  0xd5   :  { %v272_v7 = vxor.u32 2147483648, %v271_v52  ;;  %v377_v24 = vsel %vm294_vm14, %v376_v39, %v375_v12  ;;  %vm398_vm4 = vcmp.lt.s32.totalorder %v1376_v14, 0  ;;  %vm1649_vm5 = vcmp.le.f32.partialorder %v396_v51, 0.7853982 }
  0xd6   :  { %v161_v61 = vadd.s32 127, %v160_v55  ;;  %v158_v53 = vshrl.u32 %v140_v30, %v156_v49  ;;  %v1137_v11 = vmin.u32 %v462_v54, %v460_v34  ;;  %v380_v42 = vsel %vm1613_vm0, %v1379_v23, %v377_v24 }
  0xd7   :  { %v273_v44 = vsel %vm190_vm15, %v272_v7, %v271_v52  ;;  %1254 = vcosq.f32 %v380_v42  ;;  %v379_v3 = vsel %vm294_vm14, %v378_v60, %v1461_v28  ;;  %v275_v54 = vsel %vm190_vm15, %v274_v37, %v1507_v19  ;;  %v501_v37 = vld [vmem:[%s1944_s3 + $0x8] sm:$0xff] }
  0xd8   :  { %v162_v4 = vshll.u32 %v161_v61, 23  ;;  %v159_v15 = vor.u32 %v158_v53, %v157_v58  ;;  %v464_v50 = vclz %v1137_v11  ;;  %v276_v26 = vsel %vm1624_vm1, %v1383_v32, %v273_v44 }
  0xd9   :  { %1256 = vsinq.f32 %v380_v42  ;;  %v482_v61 = vsub.s32 4, %v1597_v33  ;;  %v381_v8 = vsel %vm1613_vm0, 0, %v379_v3  ;;  %v277_v28 = vsel %vm1624_vm1, 0, %v275_v54 }
  0xda   :  { %v163_v47 = vor.u32 4788187, %v162_v4  ;;  %v1138_v17 = vadd.s32 4294967294, %v464_v50  ;;  %v166_v63 = vcvt.s32.f32 %v159_v15  ;;  %1258 = vcosq.f32 %v276_v26 }
  0xdb   :  { %1260 = vsinq.f32 %v276_v26  ;;  %v483_v51 = vsel %vm398_vm4, %v482_v61, %v1597_v33  ;;  %v170_v4 = vsub.s32 4, %v1568_v56  ;;  %v385_v58 = vadd.s32 3, %v381_v8 }
  0xdc   :  { %v164_v16 = vand.u32 2147483647, %v163_v47  ;;  %vm1139_vm13 = vcmp.lt.s32.totalorder %v1138_v17, 0  ;;  %v485_v10 = vsel %vm1649_vm5, 0, %v483_v51  ;;  %v281_v33 = vadd.s32 3, %v277_v28 }
  0xdd   :  { %v467_v20 = vsel %vm1139_vm13, 0, %v1138_v17  ;;  %v171_v19 = vsel %vm86_vm2, %v170_v4, %v1568_v56  ;;  %v489_v12 = vadd.s32 3, %v485_v10  ;;  %v386_v52 = vand.u32 3, %v385_v58 }
  0xde   :  { %v167_v21 = vmul.f32 %v166_v63, %v164_v16  ;;  %v468_v22 = vsub.s32 32, %v467_v20  ;;  %v472_v6 = vsub.s32 4294967266, %v467_v20  ;;  %v469_v25 = vshll.u32 %v460_v34, %v467_v20 }
  0xdf   :  { %v173_v15 = vsel %vm1637_vm3, 0, %v171_v19  ;;  %v282_v39 = vand.u32 3, %v281_v33  ;;  %v490_v63 = vand.u32 3, %v489_v12  ;;  %vm387_vm6 = vcmp.lt.s32.totalorder %v386_v52, 2 }
  0xe0   :  { %v470_v29 = vshrl.u32 %v452_v38, %v468_v22  ;;  %v473_v48 = vadd.s32 127, %v472_v6  ;;  %v168_v5 = vxor.u32 2147483648, %v167_v21  ;;  %v177_v20 = vadd.s32 3, %v173_v15 }
  0xe1   :  { %vm388_vm7 = vcmp.eq.s32.totalorder %v386_v52, 0  ;;  %vm391_vm8 = vcmp.eq.s32.totalorder %v386_v52, 2  ;;  %vm284_vm9 = vcmp.eq.s32.totalorder %v282_v39, 0  ;;  %vm287_vm10 = vcmp.eq.s32.totalorder %v282_v39, 2 }
  0xe2   :  { %v471_v31 = vor.u32 %v470_v29, %v469_v25  ;;  %v474_v41 = vshll.u32 %v473_v48, 23  ;;  %v169_v27 = vsel %vm86_vm2, %v168_v5, %v167_v21  ;;  %vm495_vm12 = vcmp.eq.s32.totalorder %v490_v63, 2 }
  0xe3   :  { %v172_v30 = vsel %vm1637_vm3, %v1387_v35, %v169_v27  ;;  %v178_v18 = vand.u32 3, %v177_v20  ;;  %vm488_vm13 = vweird.f32 %v1376_v14  ;;  %vm492_vm14 = vcmp.eq.s32.totalorder %v490_v63, 0 }
  0xe4   :  { %v475_v45 = vor.u32 4788187, %v474_v41  ;;  %v478_v49 = vcvt.s32.f32 %v471_v31  ;;  %1262 = vcosq.f32 %v172_v30  ;;  %v1255_v11 = vpop.eup %1254  ;;  %vm491_vm15 = vcmp.lt.s32.totalorder %v490_v63, 2 }
  0xe5   :  { %1264 = vsinq.f32 %v172_v30  ;;  %v392_v17 = vxor.u32 2147483648, %v1255_v11  ;;  %vm384_vm0 = vweird.f32 %v1379_v23  ;;  %vm283_vm1 = vcmp.lt.s32.totalorder %v282_v39, 2 }
  0xe6   :  { %v476_v46 = vand.u32 2147483647, %v475_v45  ;;  %v1257_v47 = vpop.eup %1256  ;;  %vm180_vm2 = vcmp.eq.s32.totalorder %v178_v18, 0  ;;  %vm183_vm3 = vcmp.eq.s32.totalorder %v178_v18, 2 }
  0xe7   :  { %v1259_v13 = vpop.eup %1258  ;;  %v389_v16 = vxor.u32 2147483648, %v1257_v47  ;;  %v393_v24 = vsel %vm391_vm8, %v392_v17, %v1257_v47 }
  0xe8   :  { %v479_v55 = vmul.f32 %v478_v49, %v476_v46  ;;  %v1261_v50 = vpop.eup %1260  ;;  %v288_v38 = vxor.u32 2147483648, %v1259_v13 }
  0xe9   :  { %v285_v21 = vxor.u32 2147483648, %v1261_v50  ;;  %v390_v6 = vsel %vm388_vm7, %v1255_v11, %v389_v16 }
  0xea   :  { %v480_v34 = vxor.u32 2147483648, %v479_v55  ;;  %v289_v48 = vsel %vm287_vm10, %v288_v38, %v1261_v50  ;;  %v394_v45 = vsel %vm387_vm6, %v390_v6, %v393_v24  ;;  %vm176_vm6 = vweird.f32 %v1387_v35  ;;  %v503_v35 = vld [vmem:[%s1944_s3 + $0x18] sm:$0xff]  ;;  %v1022_v24 = vld [vmem:[%s1945_s4] sm:$0xff] }
  0xeb   :  { %v286_v5 = vsel %vm284_vm9, %v1259_v13, %v285_v21  ;;  %v395_v49 = vsel %vm384_vm0, nan, %v394_v45  ;;  %1206 = vmatprep.mubr.msk.f32.mxu1 %vm504_vm11, %v1022_v24 }
  0xec   :  { %v481_v43 = vsel %vm398_vm4, %v480_v34, %v479_v55  ;;  %v290_v27 = vsel %vm283_vm1, %v286_v5, %v289_v48  ;;  %vm280_vm4 = vweird.f32 %v1383_v32  ;;  %v502_v32 = vld [vmem:[%s1944_s3 + $0x10] sm:$0xff] }
  0xed   :  { %v484_v53 = vsel %vm1649_vm5, %v1376_v14, %v481_v43  ;;  %v291_v14 = vsel %vm280_vm4, nan, %v290_v27  ;;  %vm179_vm5 = vcmp.lt.s32.totalorder %v178_v18, 2 }
  0xee   :  { %1266 = vcosq.f32 %v484_v53 }
  0xef   :  { %1268 = vsinq.f32 %v484_v53 }
  0xf1   :  { %v1263_v7 = vpop.eup %1262 }
  0xf2   :  { %v1265_v22 = vpop.eup %1264  ;;  %v184_v41 = vxor.u32 2147483648, %v1263_v7 }
  0xf3   :  { %v181_v31 = vxor.u32 2147483648, %v1265_v22 }
  0xf4   :  { %v185_v60 = vsel %vm183_vm3, %v184_v41, %v1265_v22 }
  0xf5   :  { %v182_v55 = vsel %vm180_vm2, %v1263_v7, %v181_v31 }
  0xf6   :  { %v186_v36 = vsel %vm179_vm5, %v182_v55, %v185_v60 }
  0xf7   :  { %v187_v23 = vsel %vm176_vm6, nan, %v186_v36 }
  0xfb   :  { %v1267_v56 = vpop.eup %1266 }
  0xfc   :  { %v1269_v25 = vpop.eup %1268  ;;  %v496_v29 = vxor.u32 2147483648, %v1267_v56 }
  0xfd   :  { %v493_v44 = vxor.u32 2147483648, %v1269_v25 }
  0xfe   :  { %v497_v42 = vsel %vm495_vm12, %v496_v29, %v1269_v25 }
  0xff   :  { %v494_v40 = vsel %vm492_vm14, %v1267_v56, %v493_v44 }
 0x100   :  { %v498_v26 = vsel %vm491_vm15, %v494_v40, %v497_v42 }
 0x101   :  { %v499_v46 = vsel %vm488_vm13, nan, %v498_v26 }
 0x102   :  { %1182 = vmatprep.subr.mxu0 %v499_v46 }
 0x103   :  { %1183 = vmatpush3.msra.mxu0 %v499_v46 }
 0x104   :  { %1184 = vmatprep.subr.mxu0 %v395_v49 }
 0x105   :  { %1185 = vmatpush3.msra.mxu0 %v395_v49 }
 0x106   :  { %1186 = vmatprep.subr.mxu0 %v291_v14 }
 0x107   :  { %1187 = vmatpush3.msra.mxu0 %v291_v14 }
 0x108   :  { %1188 = vmatprep.subr.mxu0 %v187_v23 }
 0x109   :  { %1189 = vmatpush3.msra.mxu0 %v187_v23 }
 0x10a   :  { %1191 = vmatmul.mubr.msk.f32.vlgmr.msra.gmra.mxu0 %vm504_vm11, %v501_v37 }
 0x10b   :  { %1193 = vmatprep.mubr.msk.f32.mxu0 %vm504_vm11, %v502_v32 }
 0x10e   :  { %1194 = vmatmul.mubr.msk.f32.gmra.mxu0 %vm504_vm11, %v503_v35 }
 0x1ca   :  { %v1692_v30 = vpop.f32.mrf.mxu0 }
 0x1cb   :  { %v710_v34 = vand.u32 2147483647, %v1692_v30  ;;  %v713_v61 = vand.u32 2139095040, %v1692_v30 }
 0x1cc   :  { %v1696_v1 = vpop.f32.mrf.mxu0 }
 0x1cd   :  { %v714_v43 = vshrl.u32 %v713_v61, 23  ;;  %v717_v3 = vand.u32 8388607, %v710_v34  ;;  %v606_v53 = vand.u32 2147483647, %v1696_v1  ;;  %v609_v54 = vand.u32 2139095040, %v1696_v1 }
 0x1ce   :  { %v1702_v51 = vpop.f32.mrf.mxu0 }
 0x1cf   :  { %v1149_v4 = vadd.s32 4294967169, %v714_v43  ;;  %v610_v8 = vshrl.u32 %v609_v54, 23  ;;  %v613_v28 = vand.u32 8388607, %v606_v53  ;;  %v921_v10 = vand.u32 2139095040, %v1702_v51 }
 0x1d0   :  { %v718_v19 = vor.u32 8388608, %v717_v3 }
 0x1d1   :  { %v720_v58 = vadd.s32 1, %v1149_v4  ;;  %v1145_v11 = vadd.s32 4294967169, %v610_v8  ;;  %v614_v33 = vor.u32 8388608, %v613_v28  ;;  %v922_v47 = vshrl.u32 %v921_v10, 23 }
 0x1d2   :  { %v1707_v52 = vshll.u32 %v718_v19, 8 }
 0x1d3   :  { %vm721_vm7 = vcmp.gt.s32.totalorder %v720_v58, 0  ;;  %v616_v13 = vadd.s32 1, %v1145_v11  ;;  %v1709_v16 = vshll.u32 %v614_v33, 8  ;;  %v1157_v63 = vadd.s32 4294967169, %v922_v47 }
 0x1d4   :  { %v722_v12 = vsel %vm721_vm7, %v720_v58, 0 }
 0x1d5   :  { %v723_v15 = vshrl.u32 %v722_v12, 5  ;;  %v724_v50 = vand.u32 31, %v722_v12  ;;  %vm617_vm8 = vcmp.gt.s32.totalorder %v616_v13, 0  ;;  %v928_v37 = vadd.s32 1, %v1157_v63 }
 0x1d6   :  { %v618_v31 = vsel %vm617_vm8, %v616_v13, 0 }
 0x1d7   :  { %v725_v17 = vsub.s32 32, %v724_v50  ;;  %v727_v39 = vshll.u32 %v1310_v57, %v724_v50  ;;  %v730_v38 = vshll.u32 %v1311_v59, %v724_v50  ;;  %v733_v20 = vshll.u32 %v1312_v62, %v724_v50 }
 0x1d8   :  { %v736_v7 = vshll.u32 %v1313_v0, %v724_v50  ;;  %v739_v21 = vshll.u32 %v1314_v2, %v724_v50  ;;  %vm742_vm9 = vcmp.lt.s32.totalorder %v723_v15, 1  ;;  %vm744_vm10 = vcmp.lt.s32.totalorder %v723_v15, 3 }
 0x1d9   :  { %v728_v22 = vshrl.u32 %v1311_v59, %v725_v17  ;;  %v731_v56 = vshrl.u32 %v1312_v62, %v725_v17  ;;  %v734_v6 = vshrl.u32 %v1313_v0, %v725_v17  ;;  %v726_v25 = vshrl.u32 %v1310_v57, %v725_v17 }
 0x1da   :  { %v737_v29 = vshrl.u32 %v1314_v2, %v725_v17  ;;  %v740_v48 = vshrl.u32 %v1315_v9, %v725_v17  ;;  %vm745_vm12 = vcmp.lt.s32.totalorder %v723_v15, 4  ;;  %v620_v45 = vand.u32 31, %v618_v31 }
 0x1db   :  { %v729_v18 = vor.u32 %v728_v22, %v727_v39  ;;  %v732_v44 = vor.u32 %v731_v56, %v730_v38  ;;  %v735_v5 = vor.u32 %v734_v6, %v733_v20  ;;  %vm743_vm13 = vcmp.lt.s32.totalorder %v723_v15, 2 }
 0x1dc   :  { %v738_v41 = vor.u32 %v737_v29, %v736_v7  ;;  %v741_v42 = vor.u32 %v740_v48, %v739_v21  ;;  %v621_v14 = vsub.s32 32, %v620_v45  ;;  %v619_v43 = vshrl.u32 %v618_v31, 5 }
 0x1dd   :  { %v746_v40 = vsel %vm742_vm9, %v726_v25, %v729_v18  ;;  %v747_v26 = vsel %vm745_vm12, %v735_v5, 2102212464  ;;  %v750_v27 = vsel %vm742_vm9, %v729_v18, %v732_v44  ;;  %v754_v46 = vsel %vm742_vm9, %v732_v44, %v735_v5 }
 0x1de   :  { %v748_v49 = vsel %vm744_vm10, %v732_v44, %v747_v26  ;;  %v751_v55 = vsel %vm745_vm12, %v738_v41, 920167782  ;;  %v755_v60 = vsel %vm745_vm12, %v741_v42, 1326507024  ;;  %v623_v28 = vshll.u32 %v1310_v57, %v620_v45 }
 0x1df   :  { %v752_v36 = vsel %vm744_vm10, %v735_v5, %v751_v55  ;;  %v756_v23 = vsel %vm744_vm10, %v738_v41, %v755_v60  ;;  %v749_v32 = vsel %vm743_vm13, %v746_v40, %v748_v49  ;;  %v624_v10 = vshrl.u32 %v1311_v59, %v621_v14  ;;  %v1758_v41 = vpop.f32.mrf.mxu0 }
 0x1e0   :  { %v753_v35 = vsel %vm743_vm13, %v750_v27, %v752_v36  ;;  %v757_v61 = vsel %vm743_vm13, %v754_v46, %v756_v23  ;;  %v626_v58 = vshll.u32 %v1311_v59, %v620_v45  ;;  %v627_v19 = vshrl.u32 %v1312_v62, %v621_v14 }
 0x1e1   :  { %v1734_v3 = vmul.u32.u64.low %v1707_v52, %v757_v61  ;;  %v1735_v54 = vmul.u32.u64.high %v1707_v52, %v757_v61, %v1734_v3  ;;  %v1738_v4 = vmul.u32.u64.low %v1707_v52, %v753_v35  ;;  %v1739_v8 = vmul.u32.u64.high %v1707_v52, %v753_v35, %v1738_v4 }
 0x1e2   :  { %v629_v11 = vshll.u32 %v1312_v62, %v620_v45  ;;  %v630_v33 = vshrl.u32 %v1313_v0, %v621_v14  ;;  %v632_v47 = vshll.u32 %v1313_v0, %v620_v45  ;;  %v633_v12 = vshrl.u32 %v1314_v2, %v621_v14 }
 0x1e3   :  { %v625_v13 = vor.u32 %v624_v10, %v623_v28  ;;  %v628_v15 = vor.u32 %v627_v19, %v626_v58  ;;  %v635_v50 = vshll.u32 %v1314_v2, %v620_v45  ;;  %v636_v17 = vshrl.u32 %v1315_v9, %v621_v14 }
 0x1e4   :  { %v765_v39 = vmul.u32 %v1707_v52, %v749_v32  ;;  %vm767_vm14 = vc.u32 %v1735_v54, %v1738_v4  ;;  %v768_v63 = vadd.s32 1, %v1739_v8  ;;  %v631_v38 = vor.u32 %v630_v33, %v629_v11 }
 0x1e5   :  { %v622_v20 = vshrl.u32 %v1310_v57, %v621_v14  ;;  %v634_v7 = vor.u32 %v633_v12, %v632_v47  ;;  %v637_v21 = vor.u32 %v636_v17, %v635_v50  ;;  %vm638_vm15 = vcmp.lt.s32.totalorder %v619_v43, 1 }
 0x1e6   :  { %v769_v22 = vsel %vm767_vm14, %v768_v63, %v1739_v8  ;;  %vm640_vm0 = vcmp.lt.s32.totalorder %v619_v43, 3  ;;  %vm641_vm1 = vcmp.lt.s32.totalorder %v619_v43, 4  ;;  %v646_v56 = vsel %vm638_vm15, %v625_v13, %v628_v15 }
 0x1e7   :  { %v770_v6 = vadd.s32 %v769_v22, %v765_v39  ;;  %v643_v24 = vsel %vm641_vm1, %v631_v38, 2102212464  ;;  %v647_v25 = vsel %vm641_vm1, %v634_v7, 920167782  ;;  %v650_v52 = vsel %vm638_vm15, %v628_v15, %v631_v38 }
 0x1e8   :  { %vm639_vm2 = vcmp.lt.s32.totalorder %v619_v43, 2  ;;  %v648_v29 = vsel %vm640_vm0, %v631_v38, %v647_v25  ;;  %v651_v48 = vsel %vm641_vm1, %v637_v21, 1326507024  ;;  %vm929_vm3 = vcmp.gt.s32.totalorder %v928_v37, 0 }
 0x1e9   :  { %v642_v18 = vsel %vm638_vm15, %v622_v20, %v625_v13  ;;  %v644_v44 = vsel %vm640_vm0, %v628_v15, %v643_v24  ;;  %v649_v5 = vsel %vm639_vm2, %v646_v56, %v648_v29  ;;  %v652_v31 = vsel %vm640_vm0, %v634_v7, %v651_v48 }
 0x1ea   :  { %v653_v42 = vsel %vm639_vm2, %v650_v52, %v652_v31  ;;  %v1761_v45 = vmul.u32.u64.low %v1709_v16, %v649_v5  ;;  %v1762_v40 = vmul.u32.u64.high %v1709_v16, %v649_v5, %v1761_v45  ;;  %v918_v26 = vand.u32 2147483647, %v1702_v51 }
 0x1eb   :  { %v771_v27 = vadd.s32 536870912, %v770_v6  ;;  %v1767_v46 = vmul.u32.u64.low %v1709_v16, %v653_v42  ;;  %v1768_v49 = vmul.u32.u64.high %v1709_v16, %v653_v42, %v1767_v46  ;;  %v930_v55 = vsel %vm929_vm3, %v928_v37, 0 }
 0x1ec   :  { %v645_v60 = vsel %vm639_vm2, %v642_v18, %v644_v44  ;;  %v932_v14 = vand.u32 31, %v930_v55  ;;  %v817_v36 = vand.u32 2139095040, %v1758_v41  ;;  %v664_v23 = vadd.s32 1, %v1762_v40 }
 0x1ed   :  { %v1772_v35 = vshrl.u32 %v771_v27, 30  ;;  %v661_v61 = vmul.u32 %v1709_v16, %v645_v60  ;;  %vm663_vm4 = vc.u32 %v1768_v49, %v1761_v45  ;;  %v925_v43 = vand.u32 8388607, %v918_v26 }
 0x1ee   :  { %v933_v32 = vsub.s32 32, %v932_v14  ;;  %v665_v3 = vsel %vm663_vm4, %v664_v23, %v1762_v40  ;;  %v818_v28 = vshrl.u32 %v817_v36, 23  ;;  %v935_v58 = vshll.u32 %v1310_v57, %v932_v14 }
 0x1ef   :  { %v666_v10 = vadd.s32 %v665_v3, %v661_v61  ;;  %v938_v19 = vshll.u32 %v1311_v59, %v932_v14  ;;  %v931_v11 = vshrl.u32 %v930_v55, 5  ;;  %v941_v33 = vshll.u32 %v1312_v62, %v932_v14 }
 0x1f0   :  { %v936_v37 = vshrl.u32 %v1311_v59, %v933_v32  ;;  %v939_v8 = vshrl.u32 %v1312_v62, %v933_v32  ;;  %v942_v16 = vshrl.u32 %v1313_v0, %v933_v32  ;;  %v944_v47 = vshll.u32 %v1313_v0, %v932_v14 }
 0x1f1   :  { %v945_v12 = vshrl.u32 %v1314_v2, %v933_v32  ;;  %v773_v13 = vshll.u32 %v1772_v35, 30  ;;  %v667_v15 = vadd.s32 536870912, %v666_v10  ;;  %v947_v38 = vshll.u32 %v1314_v2, %v932_v14 }
 0x1f2   :  { %v937_v50 = vor.u32 %v936_v37, %v935_v58  ;;  %v940_v17 = vor.u32 %v939_v8, %v938_v19  ;;  %v943_v39 = vor.u32 %v942_v16, %v941_v33  ;;  %v948_v20 = vshrl.u32 %v1315_v9, %v933_v32 }
 0x1f3   :  { %v946_v63 = vor.u32 %v945_v12, %v944_v47  ;;  %v1791_v7 = vshrl.u32 %v667_v15, 30  ;;  %v926_v21 = vor.u32 8388608, %v925_v43  ;;  %vm950_vm5 = vcmp.lt.s32.totalorder %v931_v11, 1 }
 0x1f4   :  { %v949_v22 = vor.u32 %v948_v20, %v947_v38  ;;  %v1153_v56 = vadd.s32 4294967169, %v818_v28  ;;  %v1793_v24 = vsub.s32 %v770_v6, %v773_v13  ;;  %vm952_vm6 = vcmp.lt.s32.totalorder %v931_v11, 3 }
 0x1f5   :  { %vm953_vm7 = vcmp.lt.s32.totalorder %v931_v11, 4  ;;  %v958_v25 = vsel %vm950_vm5, %v937_v50, %v940_v17  ;;  %v934_v52 = vshrl.u32 %v1310_v57, %v933_v32  ;;  %v669_v44 = vshll.u32 %v1791_v7, 30 }
 0x1f6   :  { %v955_v29 = vsel %vm953_vm7, %v943_v39, 2102212464  ;;  %v959_v48 = vsel %vm953_vm7, %v946_v63, 920167782  ;;  %v963_v18 = vsel %vm953_vm7, %v949_v22, 1326507024  ;;  %v962_v31 = vsel %vm950_vm5, %v940_v17, %v943_v39 }
 0x1f7   :  { %vm951_vm8 = vcmp.lt.s32.totalorder %v931_v11, 2  ;;  %v960_v5 = vsel %vm952_vm6, %v943_v39, %v959_v48  ;;  %v964_v6 = vsel %vm952_vm6, %v946_v63, %v963_v18  ;;  %v966_v40 = vshll.u32 %v926_v21, 8 }
 0x1f8   :  { %v961_v42 = vsel %vm951_vm8, %v958_v25, %v960_v5  ;;  %v776_v27 = vsub.s32 0, %v1793_v24  ;;  %v954_v46 = vsel %vm950_vm5, %v934_v52, %v937_v50  ;;  %v956_v55 = vsel %vm952_vm6, %v940_v17, %v955_v29 }
 0x1f9   :  { %v965_v60 = vsel %vm951_vm8, %v962_v31, %v964_v6  ;;  %v1806_v14 = vmul.u32.u64.low %v966_v40, %v961_v42  ;;  %v1807_v36 = vmul.u32.u64.high %v966_v40, %v961_v42, %v1806_v14  ;;  %v824_v23 = vadd.s32 1, %v1153_v56 }
 0x1fa   :  { %v1810_v32 = vsub.s32 %v666_v10, %v669_v44  ;;  %v1812_v61 = vmul.u32.u64.low %v966_v40, %v965_v60  ;;  %v1813_v43 = vmul.u32.u64.high %v966_v40, %v965_v60, %v1812_v61  ;;  %v957_v3 = vsel %vm951_vm8, %v954_v46, %v956_v55 }
 0x1fb   :  { %vm825_vm9 = vcmp.gt.s32.totalorder %v824_v23, 0  ;;  %v814_v37 = vand.u32 2147483647, %v1758_v41  ;;  %v1150_v28 = vmin.u32 %v776_v27, %v1793_v24  ;;  %v976_v58 = vadd.s32 1, %v1807_v36 }
 0x1fc   :  { %v826_v8 = vsel %vm825_vm9, %v824_v23, 0  ;;  %v672_v16 = vsub.s32 0, %v1810_v32  ;;  %v973_v33 = vmul.u32 %v966_v40, %v957_v3  ;;  %vm975_vm10 = vc.u32 %v1813_v43, %v1806_v14 }
 0x1fd   :  { %v828_v19 = vand.u32 31, %v826_v8  ;;  %v977_v10 = vsel %vm975_vm10, %v976_v58, %v1807_v36  ;;  %v821_v11 = vand.u32 8388607, %v814_v37  ;;  %v778_v12 = vclz %v1150_v28 }
 0x1fe   :  { %v978_v13 = vadd.s32 %v977_v10, %v973_v33  ;;  %v1146_v15 = vmin.u32 %v672_v16, %v1810_v32  ;;  %v827_v18 = vshrl.u32 %v826_v8, 5  ;;  %vm920_vm4 = vcmp.lt.s32.totalorder %v1702_v51, 0 }
 0x1ff   :  { %v829_v47 = vsub.s32 32, %v828_v19  ;;  %v822_v17 = vor.u32 8388608, %v821_v11  ;;  %v1151_v38 = vadd.s32 4294967294, %v778_v12  ;;  %v831_v25 = vshll.u32 %v1310_v57, %v828_v19 }
 0x200   :  { %v979_v50 = vadd.s32 536870912, %v978_v13  ;;  %v674_v56 = vclz %v1146_v15  ;;  %v834_v52 = vshll.u32 %v1311_v59, %v828_v19  ;;  %v840_v29 = vshll.u32 %v1313_v0, %v828_v19 }
 0x201   :  { %v832_v39 = vshrl.u32 %v1311_v59, %v829_v47  ;;  %v835_v63 = vshrl.u32 %v1312_v62, %v829_v47  ;;  %v838_v21 = vshrl.u32 %v1313_v0, %v829_v47  ;;  %v841_v22 = vshrl.u32 %v1314_v2, %v829_v47 }
 0x202   :  { %v1828_v20 = vshrl.u32 %v979_v50, 30  ;;  %v837_v44 = vshll.u32 %v1312_v62, %v828_v19  ;;  %v843_v27 = vshll.u32 %v1314_v2, %v828_v19  ;;  %v844_v46 = vshrl.u32 %v1315_v9, %v829_v47 }
 0x203   :  { %v833_v5 = vor.u32 %v832_v39, %v831_v25  ;;  %v836_v31 = vor.u32 %v835_v63, %v834_v52  ;;  %v842_v42 = vor.u32 %v841_v22, %v840_v29  ;;  %vm1152_vm12 = vcmp.lt.s32.totalorder %v1151_v38, 0 }
 0x204   :  { %v981_v48 = vshll.u32 %v1828_v20, 30  ;;  %v839_v40 = vor.u32 %v838_v21, %v837_v44  ;;  %v1147_v55 = vadd.s32 4294967294, %v674_v56  ;;  %v862_v60 = vshll.u32 %v822_v17, 8 }
 0x205   :  { %v845_v36 = vor.u32 %v844_v46, %v843_v27  ;;  %vm846_vm13 = vcmp.lt.s32.totalorder %v827_v18, 1  ;;  %vm849_vm14 = vcmp.lt.s32.totalorder %v827_v18, 4  ;;  %vm847_vm15 = vcmp.lt.s32.totalorder %v827_v18, 2 }
 0x206   :  { %v982_v6 = vsub.s32 %v978_v13, %v981_v48  ;;  %vm848_vm0 = vcmp.lt.s32.totalorder %v827_v18, 3  ;;  %v854_v62 = vsel %vm846_vm13, %v833_v5, %v836_v31  ;;  %v855_v0 = vsel %vm849_vm14, %v842_v42, 920167782 }
 0x207   :  { %v851_v61 = vsel %vm849_vm14, %v839_v40, 2102212464  ;;  %v856_v3 = vsel %vm848_vm0, %v839_v40, %v855_v0  ;;  %v858_v2 = vsel %vm846_vm13, %v836_v31, %v839_v40  ;;  %v781_v8 = vsel %vm1152_vm12, 0, %v1151_v38 }
 0x208   :  { %v984_v59 = vsub.s32 0, %v982_v6  ;;  %v830_v9 = vshrl.u32 %v1310_v57, %v829_v47  ;;  %v857_v28 = vsel %vm847_vm15, %v854_v62, %v856_v3  ;;  %v859_v58 = vsel %vm849_vm14, %v845_v36, 1326507024 }
 0x209   :  { %v860_v16 = vsel %vm848_vm0, %v842_v42, %v859_v58  ;;  %v1845_v33 = vmul.u32.u64.low %v862_v60, %v857_v28  ;;  %v1846_v10 = vmul.u32.u64.high %v862_v60, %v857_v28, %v1845_v33  ;;  %vm1148_vm1 = vcmp.lt.s32.totalorder %v1147_v55, 0 }
 0x20a   :  { %v1158_v23 = vmin.u32 %v984_v59, %v982_v6  ;;  %v850_v11 = vsel %vm846_vm13, %v830_v9, %v833_v5  ;;  %v852_v12 = vsel %vm848_vm0, %v836_v31, %v851_v61  ;;  %v861_v13 = vsel %vm847_vm15, %v858_v2, %v860_v16 }
 0x20b   :  { %v1852_v50 = vmul.u32.u64.low %v862_v60, %v861_v13  ;;  %v1853_v57 = vmul.u32.u64.high %v862_v60, %v861_v13, %v1852_v50  ;;  %v786_v47 = vsub.s32 4294967266, %v781_v8  ;;  %v677_v17 = vsel %vm1148_vm1, 0, %v1147_v55 }
 0x20c   :  { %v986_v19 = vclz %v1158_v23  ;;  %v853_v39 = vsel %vm847_vm15, %v850_v11, %v852_v12  ;;  %v872_v63 = vadd.s32 1, %v1846_v10  ;;  %v974_v21 = vadd.s32 %v1806_v14, %v1813_v43 }
 0x20d   :  { %v787_v25 = vadd.s32 127, %v786_v47  ;;  %v682_v52 = vsub.s32 4294967266, %v677_v17  ;;  %v869_v29 = vmul.u32 %v862_v60, %v853_v39  ;;  %vm871_vm3 = vc.u32 %v1853_v57, %v1845_v33 }
 0x20e   :  { %v1159_v15 = vadd.s32 4294967294, %v986_v19  ;;  %v873_v18 = vsel %vm871_vm3, %v872_v63, %v1846_v10  ;;  %v782_v42 = vsub.s32 32, %v781_v8  ;;  %v766_v14 = vadd.s32 %v1738_v4, %v1735_v54 }
 0x20f   :  { %v874_v31 = vadd.s32 %v873_v18, %v869_v29  ;;  %v683_v46 = vadd.s32 127, %v682_v52  ;;  %v788_v43 = vshll.u32 %v787_v25, 23  ;;  %v678_v60 = vsub.s32 32, %v677_v17 }
 0x210   :  { %vm1160_vm2 = vcmp.lt.s32.totalorder %v1159_v15, 0  ;;  %v784_v62 = vshrl.u32 %v766_v14, %v782_v42  ;;  %v662_v23 = vadd.s32 %v1761_v45, %v1768_v49  ;;  %v783_v2 = vshll.u32 %v1793_v24, %v781_v8 }
 0x211   :  { %v989_v38 = vsel %vm1160_vm2, 0, %v1159_v15  ;;  %v875_v55 = vadd.s32 536870912, %v874_v31  ;;  %v684_v61 = vshll.u32 %v683_v46, 23  ;;  %v789_v9 = vor.u32 4788187, %v788_v43 }
 0x212   :  { %v990_v22 = vsub.s32 32, %v989_v38  ;;  %v994_v56 = vsub.s32 4294967266, %v989_v38  ;;  %v991_v48 = vshll.u32 %v982_v6, %v989_v38  ;;  %v680_v58 = vshrl.u32 %v662_v23, %v678_v60 }
 0x213   :  { %v1864_v36 = vshrl.u32 %v875_v55, 30  ;;  %v785_v4 = vor.u32 %v784_v62, %v783_v2  ;;  %v679_v16 = vshll.u32 %v1810_v32, %v677_v17  ;;  %v685_v10 = vor.u32 4788187, %v684_v61 }
 0x214   :  { %v992_v44 = vshrl.u32 %v974_v21, %v990_v22  ;;  %v995_v5 = vadd.s32 127, %v994_v56  ;;  %v1004_v11 = vsub.s32 4, %v1828_v20  ;;  %v790_v45 = vand.u32 2147483647, %v789_v9 }
 0x215   :  { %v877_v3 = vshll.u32 %v1864_v36, 30  ;;  %vm1875_vm5 = vcmp.le.f32.partialorder %v918_v26, 0.7853982  ;;  %v681_v8 = vor.u32 %v680_v58, %v679_v16  ;;  %v792_v50 = vcvt.s32.f32 %v785_v4 }
 0x216   :  { %v993_v40 = vor.u32 %v992_v44, %v991_v48  ;;  %v996_v27 = vshll.u32 %v995_v5, 23  ;;  %v686_v32 = vand.u32 2147483647, %v685_v10  ;;  %v1005_v47 = vsel %vm920_vm4, %v1004_v11, %v1828_v20 }
 0x217   :  { %v878_v54 = vsub.s32 %v874_v31, %v877_v3  ;;  %v793_v39 = vmul.f32 %v792_v50, %v790_v45  ;;  %v688_v63 = vcvt.s32.f32 %v681_v8  ;;  %v1007_v38 = vsel %vm1875_vm5, 0, %v1005_v47 }
 0x218   :  { %v997_v59 = vor.u32 4788187, %v996_v27  ;;  %v1000_v0 = vcvt.s32.f32 %v993_v40  ;;  %v870_v25 = vadd.s32 %v1845_v33, %v1853_v57  ;;  %v1011_v48 = vadd.s32 3, %v1007_v38 }
 0x219   :  { %v880_v12 = vsub.s32 0, %v878_v54  ;;  %v689_v21 = vmul.f32 %v688_v63, %v686_v32  ;;  %v794_v22 = vxor.u32 2147483648, %v793_v39  ;;  %vm712_vm7 = vcmp.lt.s32.totalorder %v1692_v30, 0 }
 0x21a   :  { %v998_v6 = vand.u32 2147483647, %v997_v59  ;;  %v1012_v27 = vand.u32 3, %v1011_v48  ;;  %vm608_vm8 = vcmp.lt.s32.totalorder %v1696_v1, 0  ;;  %vm1893_vm9 = vcmp.le.f32.partialorder %v710_v34, 0.7853982 }
 0x21b   :  { %v1154_v15 = vmin.u32 %v880_v12, %v878_v54  ;;  %v690_v44 = vxor.u32 2147483648, %v689_v21  ;;  %v795_v31 = vsel %vm712_vm7, %v794_v22, %v793_v39  ;;  %vm1904_vm10 = vcmp.le.f32.partialorder %v606_v53, 0.7853982 }
 0x21c   :  { %v1001_v28 = vmul.f32 %v1000_v0, %v998_v6  ;;  %v798_v43 = vsel %vm1893_vm9, %v1692_v30, %v795_v31  ;;  %vm1017_vm12 = vcmp.eq.s32.totalorder %v1012_v27, 2  ;;  %vm1014_vm13 = vcmp.eq.s32.totalorder %v1012_v27, 0 }
 0x21d   :  { %v882_v17 = vclz %v1154_v15  ;;  %v691_v57 = vsel %vm608_vm8, %v690_v44, %v689_v21  ;;  %vm1013_vm14 = vcmp.lt.s32.totalorder %v1012_v27, 2  ;;  %vm1010_vm15 = vweird.f32 %v1702_v51 }
 0x21e   :  { %v1002_v19 = vxor.u32 2147483648, %v1001_v28  ;;  %v694_v0 = vsel %vm1904_vm10, %v1696_v1, %v691_v57  ;;  %v796_v2 = vsub.s32 4, %v1772_v35  ;;  %vm816_vm0 = vcmp.lt.s32.totalorder %v1758_v41, 0 }
 0x21f   :  { %v1155_v26 = vadd.s32 4294967294, %v882_v17  ;;  %v900_v58 = vsub.s32 4, %v1864_v36  ;;  %vm815_vm1 = vcmp.le.f32.partialorder %v814_v37, 0.7853982 }
 0x220   :  { %v1003_v24 = vsel %vm920_vm4, %v1002_v19, %v1001_v28  ;;  %v797_v19 = vsel %vm712_vm7, %v796_v2, %v1772_v35 }
 0x221   :  { %v1006_v13 = vsel %vm1875_vm5, %v1702_v51, %v1003_v24  ;;  %vm1156_vm6 = vcmp.lt.s32.totalorder %v1155_v26, 0  ;;  %v901_v16 = vsel %vm816_vm0, %v900_v58, %v1864_v36  ;;  %v799_v11 = vsel %vm1893_vm9, 0, %v797_v19 }
 0x222   :  { %1270 = vcosq.f32 %v1006_v13  ;;  %v885_v56 = vsel %vm1156_vm6, 0, %v1155_v26  ;;  %v903_v37 = vsel %vm815_vm1, 0, %v901_v16  ;;  %v803_v45 = vadd.s32 3, %v799_v11 }
 0x223   :  { %1272 = vsinq.f32 %v1006_v13  ;;  %v886_v52 = vsub.s32 32, %v885_v56  ;;  %v890_v29 = vsub.s32 4294967266, %v885_v56  ;;  %v887_v20 = vshll.u32 %v878_v54, %v885_v56 }
 0x224   :  { %1274 = vcosq.f32 %v798_v43  ;;  %v692_v54 = vsub.s32 4, %v1791_v7  ;;  %v907_v24 = vadd.s32 3, %v903_v37  ;;  %v804_v36 = vand.u32 3, %v803_v45 }
 0x225   :  { %v888_v5 = vshrl.u32 %v870_v25, %v886_v52  ;;  %v891_v18 = vadd.s32 127, %v890_v29  ;;  %1276 = vsinq.f32 %v798_v43 }
 0x226   :  { %1278 = vcosq.f32 %v694_v0  ;;  %v693_v10 = vsel %vm608_vm8, %v692_v54, %v1791_v7  ;;  %v908_v50 = vand.u32 3, %v907_v24  ;;  %vm805_vm2 = vcmp.lt.s32.totalorder %v804_v36, 2 }
 0x227   :  { %v889_v42 = vor.u32 %v888_v5, %v887_v20  ;;  %v892_v40 = vshll.u32 %v891_v18, 23  ;;  %1280 = vsinq.f32 %v694_v0  ;;  %v695_v12 = vsel %vm1904_vm10, 0, %v693_v10 }
 0x228   :  { %v699_v35 = vadd.s32 3, %v695_v12  ;;  %vm806_vm3 = vcmp.eq.s32.totalorder %v804_v36, 0  ;;  %vm809_vm4 = vcmp.eq.s32.totalorder %v804_v36, 2  ;;  %vm913_vm5 = vcmp.eq.s32.totalorder %v908_v50, 2 }
 0x229   :  { %v893_v55 = vor.u32 4788187, %v892_v40  ;;  %v896_v62 = vcvt.s32.f32 %v889_v42  ;;  %vm910_vm6 = vcmp.eq.s32.totalorder %v908_v50, 0  ;;  %vm909_vm9 = vcmp.lt.s32.totalorder %v908_v50, 2 }
 0x22a   :  { %v700_v17 = vand.u32 3, %v699_v35  ;;  %vm906_vm10 = vweird.f32 %v1758_v41 }
 0x22b   :  { %v894_v34 = vand.u32 2147483647, %v893_v55 }
 0x22c   :  { %vm702_vm7 = vcmp.eq.s32.totalorder %v700_v17, 0  ;;  %vm705_vm8 = vcmp.eq.s32.totalorder %v700_v17, 2 }
 0x22d   :  { %v897_v61 = vmul.f32 %v896_v62, %v894_v34 }
 0x22f   :  { %v1271_v46 = vpop.eup %1270  ;;  %v898_v9 = vxor.u32 2147483648, %v897_v61 }
 0x230   :  { %v1273_v14 = vpop.eup %1272  ;;  %v1018_v60 = vxor.u32 2147483648, %v1271_v46 }
 0x231   :  { %v1015_v6 = vxor.u32 2147483648, %v1273_v14  ;;  %v899_v4 = vsel %vm816_vm0, %v898_v9, %v897_v61  ;;  %v1275_v49 = vpop.eup %1274 }
 0x232   :  { %v1019_v23 = vsel %vm1017_vm12, %v1018_v60, %v1273_v14  ;;  %v902_v51 = vsel %vm815_vm1, %v1758_v41, %v899_v4  ;;  %v1277_v8 = vpop.eup %1276  ;;  %v810_v47 = vxor.u32 2147483648, %v1275_v49  ;;  %vm701_vm12 = vcmp.lt.s32.totalorder %v700_v17, 2  ;;  %v1023_v41 = vld [vmem:[%s1945_s4 + $0x8] sm:$0x3] }
 0x233   :  { %v1016_v3 = vsel %vm1014_vm13, %v1271_v46, %v1015_v6  ;;  %1282 = vcosq.f32 %v902_v51  ;;  %v1279_v13 = vpop.eup %1278  ;;  %v807_v32 = vxor.u32 2147483648, %v1277_v8  ;;  %vm802_vm13 = vweird.f32 %v1692_v30 }
 0x234   :  { %v1020_v53 = vsel %vm1013_vm14, %v1016_v3, %v1019_v23  ;;  %1284 = vsinq.f32 %v902_v51  ;;  %v1281_v15 = vpop.eup %1280  ;;  %v706_v63 = vxor.u32 2147483648, %v1279_v13  ;;  %v811_v56 = vsel %vm809_vm4, %v810_v47, %v1277_v8 }
 0x235   :  { %v1021_v28 = vsel %vm1010_vm15, nan, %v1020_v53  ;;  %v703_v39 = vxor.u32 2147483648, %v1281_v15  ;;  %v808_v22 = vsel %vm806_vm3, %v1275_v49, %v807_v32  ;;  %vm698_vm14 = vweird.f32 %v1696_v1 }
 0x236   :  { %1198 = vmatprep.subr.mxu1 %v1021_v28  ;;  %v707_v48 = vsel %vm705_vm8, %v706_v63, %v1281_v15  ;;  %v812_v20 = vsel %vm805_vm2, %v808_v22, %v811_v56 }
 0x237   :  { %1199 = vmatpush3.msra.mxu1 %v1021_v28  ;;  %v704_v29 = vsel %vm702_vm7, %v1279_v13, %v703_v39  ;;  %v813_v31 = vsel %vm802_vm13, nan, %v812_v20 }
 0x238   :  { %v708_v18 = vsel %vm701_vm12, %v704_v29, %v707_v48 }
 0x239   :  { %v709_v42 = vsel %vm698_vm14, nan, %v708_v18 }
 0x240   :  { %v1283_v7 = vpop.eup %1282 }
 0x241   :  { %v1285_v26 = vpop.eup %1284  ;;  %v914_v38 = vxor.u32 2147483648, %v1283_v7 }
 0x242   :  { %v911_v21 = vxor.u32 2147483648, %v1285_v26 }
 0x243   :  { %v915_v25 = vsel %vm913_vm5, %v914_v38, %v1285_v26 }
 0x244   :  { %v912_v52 = vsel %vm910_vm6, %v1283_v7, %v911_v21 }
 0x245   :  { %v916_v44 = vsel %vm909_vm9, %v912_v52, %v915_v25 }
 0x246   :  { %v917_v5 = vsel %vm906_vm10, nan, %v916_v44 }
 0x247   :  { %1200 = vmatprep.subr.mxu1 %v917_v5 }
 0x248   :  { %1201 = vmatpush3.msra.mxu1 %v917_v5 }
 0x249   :  { %1202 = vmatprep.subr.mxu1 %v813_v31 }
 0x24a   :  { %1203 = vmatpush3.msra.mxu1 %v813_v31 }
 0x24b   :  { %1204 = vmatprep.subr.mxu1 %v709_v42 }
 0x24c   :  { %1205 = vmatpush3.msra.mxu1 %v709_v42 }
 0x24d   :  { %1207 = vmatmul.mubr.msk.f32.vlgmr.msra.gmra.mxu1 %vm504_vm11, %v1023_v41 }
 0x30d   :  { %v1208_v40 = vpop.f32.mrf.mxu1 }
 0x30e   :  { %1106 = vst [vmem:[#allocation2 + $0x8] sm:$0x3] %v1208_v40 }
 0x30f   :  { %v1096_v30 = vpop.f32.mrf.mxu1 }
 0x310   :  { %1105 = vst [vmem:[#allocation2] sm:$0xff] %v1096_v30 }
 0x311   :  { %1297 = shalt.err (!%p1294_p4)
}
 0x312   :  { %s1317_s22 = smov 128   ;;  %s1318_s4 = smov 8  }
 0x313   :  { %1118 = dma.vmem_to_hbm [thread:$0]  %s1113_s20, 256, %s1946_s5, [#allocation3], %s1317_s22, %s1317_s22, %s1318_s4  }
 0x314   :  { %1306 = dma.done.wait [#allocation3], 256  }
 0x315   :  { %1307 = vsyncadd [#allocation3], 4294967040 }
 0x316   :  { %1122 = vsyncpa [#allocation3], 1 }

</bundles_post_ra>
